<compile_context>
chip_gen: v7x
topology: tpu7x:2x2x1
jax: 0.10.0
libtpu: 0.0.40
codegen_flags: <defaults>
</compile_context>

<pallas_src>
import jax
import jax.numpy as jnp
from jax.experimental import pallas as pl
from jax.experimental.pallas import tpu as pltpu


BN_EPS = 1e-5


def classification_branch_kernel(
    x_ref,        # (TN, HW, C)  compute dtype (bf16)
    scale_ref,    # (1, C)  f32   gamma * rsqrt(var + eps)
    shift_ref,    # (1, C)  f32   beta - mean * scale
    w_ref,        # (C, TK) compute dtype  -- PyTorch linear.weight.T tile
    logits_ref,   # (TN, TK) f32
    emb_ref,      # (TN, C)  f32
    emb_acc,      # VMEM scratch (TN, C) f32, persists across the K axis
):
    # Pool + ReLU + BN only once per N-tile (x / emb blocks are resident
    # across the K axis because their block index does not depend on k).
    @pl.when(pl.program_id(1) == 0)
    def _():
        # Global max over spatial (sublane axis); selection, exact in bf16.
        pooled = jnp.max(x_ref[...], axis=1)                       # (TN, C)
        # ReLU + folded BN in f32 (v5e VPU has no bf16).
        pooled = jnp.maximum(pooled.astype(jnp.float32), 0.0)
        emb = pooled * scale_ref[...] + shift_ref[...]             # (TN, C)
        emb_acc[...] = emb
        emb_ref[...] = emb.astype(emb_ref.dtype)

    # Linear (no bias): (TN, C) @ (C, TK) on the MXU, f32 accumulation.
    logits_ref[...] = jnp.dot(
        emb_acc[...].astype(w_ref.dtype),
        w_ref[...],
        preferred_element_type=jnp.float32,
    ).astype(logits_ref.dtype)


def _choose_tiles(n, hw, c, k, itemsize):
    """Pick (TN, TK) that satisfy layout rules and a conservative VMEM budget."""
    # K tile: lane-dense (multiple of 128) when K is large, else the full K.
    tk = k if k <= 512 else 512
    # N tile: start large, shrink until double-buffered x + W tiles fit a
    # budget that is safe on v7x's 64 MiB VMEM (and the default scoped limits).
    budget = 24 * 1024 * 1024
    tn = min(n, 64)

    def vmem_bytes(tn_):
        return 2 * tn_ * hw * c * itemsize + 2 * c * tk * itemsize

    while tn > 8 and vmem_bytes(tn) > budget:
        tn //= 2
    return tn, tk


def classification_branch(x_nchw, params, endpoints, *,
                          compute_dtype=jnp.bfloat16):
    """x_nchw: (N, C, H, W).  params: dict of arrays (see init_params)."""
    n, c, h, w = x_nchw.shape
    hw = h * w
    w_t = params["linear_w_t"].astype(compute_dtype)          # (C, K)
    k = w_t.shape[1]

    # NCHW -> (N, HW, C): pooling is a sublane reduce, C is lane-dense.
    x3 = jnp.transpose(x_nchw, (0, 2, 3, 1)).reshape(n, hw, c)
    x3 = x3.astype(compute_dtype)

    # Fold BN (inference running stats) into scale/shift, once, in the wrapper.
    scale = params["bn_gamma"] * jax.lax.rsqrt(params["bn_var"] + BN_EPS)
    shift = params["bn_beta"] - params["bn_mean"] * scale
    scale = scale.astype(jnp.float32)                          # (1, C)
    shift = shift.astype(jnp.float32)                          # (1, C)

    tn, tk = _choose_tiles(n, hw, c, k, jnp.dtype(compute_dtype).itemsize)
    grid = (pl.cdiv(n, tn), pl.cdiv(k, tk))

    logits, emb = pl.pallas_call(
        classification_branch_kernel,
        out_shape=(
            jax.ShapeDtypeStruct((n, k), jnp.float32),
            jax.ShapeDtypeStruct((n, c), jnp.float32),
        ),
        grid_spec=pltpu.PrefetchScalarGridSpec(
            num_scalar_prefetch=0,
            grid=grid,
            in_specs=[
                pl.BlockSpec((tn, hw, c), lambda i, j: (i, 0, 0)),  # x
                pl.BlockSpec((1, c), lambda i, j: (0, 0)),          # scale
                pl.BlockSpec((1, c), lambda i, j: (0, 0)),          # shift
                pl.BlockSpec((c, tk), lambda i, j: (0, j)),         # W^T
            ],
            out_specs=(
                pl.BlockSpec((tn, tk), lambda i, j: (i, j)),        # logits
                pl.BlockSpec((tn, c), lambda i, j: (i, 0)),         # emb
            ),
            scratch_shapes=[pltpu.VMEM((tn, c), jnp.float32)],
        ),
        compiler_params=pltpu.CompilerParams(
            dimension_semantics=("parallel", "arbitrary"),
        ),
    )(x3, scale, shift, w_t)

    endpoints["softmax"] = [logits]
    endpoints["class_emb"] = emb
    return endpoints


def init_params(key, input_dim, num_classes):
    # weights_init_classifier: normal(std=0.001) on linear weight (no bias).
    w = 0.001 * jax.random.normal(key, (num_classes, input_dim), jnp.float32)
    # weights_init_kaiming on BatchNorm1d: weight=1, bias=0 (bias frozen).
    return {
        "linear_w_t": w.T,                                      # (C, K)
        "bn_gamma": jnp.ones((1, input_dim), jnp.float32),
        "bn_beta": jnp.zeros((1, input_dim), jnp.float32),
        "bn_mean": jnp.zeros((1, input_dim), jnp.float32),
        "bn_var": jnp.ones((1, input_dim), jnp.float32),
    }


def create_endpoints():
    return {"softmax": None}


if __name__ == "__main__":
    N, C, H, W = 2, 4, 16, 16
    NUM_CLASSES = 8
    CDT = jnp.bfloat16

    key = jax.random.PRNGKey(0)
    k_x, k_w = jax.random.split(key)

    x = jax.random.normal(k_x, (N, C, H, W), jnp.float32)
    params = init_params(k_w, input_dim=C, num_classes=NUM_CLASSES)

    endpoints = create_endpoints()
    endpoints = classification_branch(x, params, endpoints, compute_dtype=CDT)

    logits = jax.block_until_ready(endpoints["softmax"][0])
    emb = jax.block_until_ready(endpoints["class_emb"])

    # Pure-JAX reference with the same dtype chain as the kernel.
    x_bf = jnp.transpose(x, (0, 2, 3, 1)).reshape(N, H * W, C).astype(CDT)
    pooled = jnp.maximum(jnp.max(x_bf, axis=1).astype(jnp.float32), 0.0)
    scale = params["bn_gamma"] * jax.lax.rsqrt(params["bn_var"] + BN_EPS)
    shift = params["bn_beta"] - params["bn_mean"] * scale
    emb_ref = pooled * scale + shift
    logits_ref = jnp.dot(
        emb_ref.astype(CDT), params["linear_w_t"].astype(CDT),
        preferred_element_type=jnp.float32,
    )

    assert logits.shape == (N, NUM_CLASSES) and emb.shape == (N, C)
    assert jnp.allclose(emb, emb_ref, atol=1e-5), "emb mismatch"
    assert jnp.allclose(logits, logits_ref, atol=1e-4, rtol=1e-3), "logits mismatch"

    # Loose sanity check against full-f32 math (bf16 rounding tolerance).
    pooled32 = jnp.maximum(jnp.max(x.reshape(N, C, H * W), axis=-1), 0.0)
    emb32 = pooled32 * scale + shift
    logits32 = emb32 @ params["linear_w_t"]
    assert jnp.allclose(emb, emb32, atol=5e-2)
    assert jnp.allclose(logits, logits32, atol=1e-3)

    print("KERNEL_OK")
</pallas_src>

<mosaic_0001>
module attributes {stable_mosaic.version = 11 : i64} {
  func.func @classification_branch_kernel(%arg0: i32, %arg1: i32, %arg2: memref<2x256x4xbf16, #tpu.memory_space<vmem>>, %arg3: memref<1x4xf32, #tpu.memory_space<vmem>>, %arg4: memref<1x4xf32, #tpu.memory_space<vmem>>, %arg5: memref<4x8xbf16, #tpu.memory_space<vmem>>, %arg6: memref<2x8xf32, #tpu.memory_space<vmem>>, %arg7: memref<2x4xf32, #tpu.memory_space<vmem>>, %arg8: memref<2x4xf32, #tpu.memory_space<vmem>>) attributes {dimension_semantics = [#tpu.dimension_semantics<parallel>, #tpu.dimension_semantics<arbitrary>], iteration_bounds = array<i64: 1, 1>, scalar_prefetch = 0 : i64, scratch_operands = 1 : i64, tpu.core_type = #tpu.core_type<tc>, window_params = [{transform_indices = @transform_0, window_bounds = array<i64: 2, 256, 4>}, {pipeline_mode = #tpu.pipeline_mode<synchronous>, transform_indices = @transform_1, window_bounds = array<i64: 1, 4>}, {pipeline_mode = #tpu.pipeline_mode<synchronous>, transform_indices = @transform_2, window_bounds = array<i64: 1, 4>}, {transform_indices = @transform_3, window_bounds = array<i64: 4, 8>}, {transform_indices = @transform_4, window_bounds = array<i64: 2, 8>}, {transform_indices = @transform_5, window_bounds = array<i64: 2, 4>}]} {
    %c0_i32 = arith.constant 0 : i32
    %0 = arith.cmpi eq, %arg1, %c0_i32 : i32
    %1 = arith.extui %0 : i1 to i32
    %c0_i32_0 = arith.constant 0 : i32
    %2 = arith.cmpi ne, %1, %c0_i32_0 : i32
    scf.if %2 {
      %c0_6 = arith.constant 0 : index
      %c0_7 = arith.constant 0 : index
      %c0_8 = arith.constant 0 : index
      %8 = vector.load %arg2[%c0_6, %c0_7, %c0_8] : memref<2x256x4xbf16, #tpu.memory_space<vmem>>, vector<2x256x4xbf16>
      %cst_9 = arith.constant dense<0xFF80> : vector<2x4xbf16>
      %9 = vector.multi_reduction <maximumf>, %8, %cst_9 [1] : vector<2x256x4xbf16> to vector<2x4xbf16>
      %10 = arith.extf %9 : vector<2x4xbf16> to vector<2x4xf32>
      %cst_10 = arith.constant 0.000000e+00 : f32
      %11 = vector.broadcast %cst_10 : f32 to vector<2x4xf32>
      %12 = arith.maximumf %10, %11 : vector<2x4xf32>
      %c0_11 = arith.constant 0 : index
      %c0_12 = arith.constant 0 : index
      %13 = vector.load %arg3[%c0_11, %c0_12] : memref<1x4xf32, #tpu.memory_space<vmem>>, vector<1x4xf32>
      %14 = vector.broadcast %13 : vector<1x4xf32> to vector<2x4xf32>
      %15 = arith.mulf %12, %14 : vector<2x4xf32>
      %c0_13 = arith.constant 0 : index
      %c0_14 = arith.constant 0 : index
      %16 = vector.load %arg4[%c0_13, %c0_14] : memref<1x4xf32, #tpu.memory_space<vmem>>, vector<1x4xf32>
      %17 = vector.broadcast %16 : vector<1x4xf32> to vector<2x4xf32>
      %18 = arith.addf %15, %17 : vector<2x4xf32>
      %c0_15 = arith.constant 0 : index
      %c0_16 = arith.constant 0 : index
      %19 = vector.load %arg8[%c0_15, %c0_16] : memref<2x4xf32, #tpu.memory_space<vmem>>, vector<2x4xf32>
      tpu.vector_store %arg8[%c0_15, %c0_16], %18 {strides = array<i32>} : memref<2x4xf32, #tpu.memory_space<vmem>>, vector<2x4xf32>,
      %c0_17 = arith.constant 0 : index
      %c0_18 = arith.constant 0 : index
      %20 = vector.load %arg7[%c0_17, %c0_18] : memref<2x4xf32, #tpu.memory_space<vmem>>, vector<2x4xf32>
      tpu.vector_store %arg7[%c0_17, %c0_18], %18 {strides = array<i32>} : memref<2x4xf32, #tpu.memory_space<vmem>>, vector<2x4xf32>,
    } else {
    }
    %c0 = arith.constant 0 : index
    %c0_1 = arith.constant 0 : index
    %3 = vector.load %arg8[%c0, %c0_1] : memref<2x4xf32, #tpu.memory_space<vmem>>, vector<2x4xf32>
    %4 = arith.truncf %3 : vector<2x4xf32> to vector<2x4xbf16>
    %c0_2 = arith.constant 0 : index
    %c0_3 = arith.constant 0 : index
    %5 = vector.load %arg5[%c0_2, %c0_3] : memref<4x8xbf16, #tpu.memory_space<vmem>>, vector<4x8xbf16>
    %cst = arith.constant dense<0.000000e+00> : vector<2x8xf32>
    %6 = tpu.matmul %4, %5, %cst {dimension_numbers = #tpu.dot_dimension_numbers<[1], [0], [0], [1], [0, 0, 1, 1], [], []>} : vector<2x4xbf16>, vector<4x8xbf16>, vector<2x8xf32> -> vector<2x8xf32>
    %c0_4 = arith.constant 0 : index
    %c0_5 = arith.constant 0 : index
    %7 = vector.load %arg6[%c0_4, %c0_5] : memref<2x8xf32, #tpu.memory_space<vmem>>, vector<2x8xf32>
    tpu.vector_store %arg6[%c0_4, %c0_5], %6 {strides = array<i32>} : memref<2x8xf32, #tpu.memory_space<vmem>>, vector<2x8xf32>,
    return
  }
  func.func @transform_0(%arg0: i32, %arg1: i32) -> (i32, i32, i32) {
    %c0_i32 = arith.constant 0 : i32
    %c0_i32_0 = arith.constant 0 : i32
    %c0_i32_1 = arith.constant 0 : i32
    return %arg0, %c0_i32, %c0_i32_0 : i32, i32, i32
  }
  func.func @transform_1(%arg0: i32, %arg1: i32) -> (i32, i32) {
    %c0_i32 = arith.constant 0 : i32
    %c0_i32_0 = arith.constant 0 : i32
    %c0_i32_1 = arith.constant 0 : i32
    return %c0_i32, %c0_i32_0 : i32, i32
  }
  func.func @transform_2(%arg0: i32, %arg1: i32) -> (i32, i32) {
    %c0_i32 = arith.constant 0 : i32
    %c0_i32_0 = arith.constant 0 : i32
    %c0_i32_1 = arith.constant 0 : i32
    return %c0_i32, %c0_i32_0 : i32, i32
  }
  func.func @transform_3(%arg0: i32, %arg1: i32) -> (i32, i32) {
    %c0_i32 = arith.constant 0 : i32
    %c0_i32_0 = arith.constant 0 : i32
    return %c0_i32, %arg1 : i32, i32
  }
  func.func @transform_4(%arg0: i32, %arg1: i32) -> (i32, i32) {
    %c0_i32 = arith.constant 0 : i32
    return %arg0, %arg1 : i32, i32
  }
  func.func @transform_5(%arg0: i32, %arg1: i32) -> (i32, i32) {
    %c0_i32 = arith.constant 0 : i32
    %c0_i32_0 = arith.constant 0 : i32
    return %arg0, %c0_i32 : i32, i32
  }
}

</mosaic_0001>

<bundles_post_ra>
// kernel: tpu_custom_call.1
= control target key start
LH: loop header
LB: loop body
LE: loop exit
PB: predicated region body
PF: predicated region fallthrough
CT: control target
= control target key end

     0   :  { %11 = vsyncpa [#allocation4], 0  ;;  %vm437_vm0 = vcmask 1041408   ;;  %v638_v1 = vmov 0.0   ;;  %vm639_vm1 = vmmov 0   ;;  %vm251_vm2 = vcmask 31744   ;;  %s834_s0 = inlined_call_operand.vmem [shape: bf16[2,256,4], index: 0, kind: input, shape index: {}]   ;;  %s835_s1 = inlined_call_operand.vmem [shape: f32[1,4], index: 1, kind: input, shape index: {}]   ;;  %s836_s2 = inlined_call_operand.vmem [shape: f32[1,4], index: 2, kind: input, shape index: {}]   ;;  %s837_s3 = inlined_call_operand.vmem [shape: bf16[4,8], index: 3, kind: input, shape index: {}]   ;;  %s838_s4 = inlined_call_operand.hbm [shape: f32[2,8], index: 4, kind: output, shape index: {0}]   ;;  %s839_s5 = inlined_call_operand.hbm [shape: f32[2,4], index: 5, kind: output, shape index: {1}]  }
   0x1   :  { %v432_v0 = vld [vmem:[%s837_s3] sm:$0x3]  ;;  %548 = vmatprep.subr.bf16.mxu0 %v638_v1  ;;  %550 = vmatprep.mubr.msk.bf16.mxu0 %vm639_vm1, %v638_v1  ;;  %v559_v4 = vld [vmem:[%s834_s0 + $0x8] sm:$0xff]   ;;  %v560_v5 = vld [vmem:[%s834_s0 + $0x10] sm:$0xff]  }
   0x2   :  { %v439_v2 = vsel %vm437_vm0, %v432_v0, 0  ;;  %v558_v3 = vld [vmem:[%s834_s0] sm:$0xff]   ;;  %v561_v6 = vld [vmem:[%s834_s0 + $0x18] sm:$0xff]   ;;  %v563_v9 = vld [vmem:[%s834_s0 + $0x28] sm:$0xff]   ;;  %v257_v10 = vsel %vm251_vm2, %v559_v4, 4286644096 }
   0x3   :  { %549 = vmatpush3.bf16.msra.mxu0 %v439_v2  ;;  %v562_v7 = vld [vmem:[%s834_s0 + $0x20] sm:$0xff]   ;;  %v254_v8 = vsel %vm251_vm2, %v558_v3, 4286644096  ;;  %v564_v11 = vld [vmem:[%s834_s0 + $0x30] sm:$0xff]   ;;  %v260_v12 = vsel %vm251_vm2, %v560_v5, 4286644096 }
   0x4   :  { %v565_v13 = vld [vmem:[%s834_s0 + $0x38] sm:$0xff]   ;;  %v262_v14 = vmax.bf16 %v260_v12, %v254_v8  ;;  %v264_v15 = vsel %vm251_vm2, %v561_v6, 4286644096  ;;  %v566_v16 = vld [vmem:[%s834_s0 + $0x40] sm:$0xff]   ;;  %v567_v17 = vld [vmem:[%s834_s0 + $0x48] sm:$0xff]  }
   0x5   :  { %v266_v18 = vmax.bf16 %v264_v15, %v257_v10  ;;  %v268_v19 = vsel %vm251_vm2, %v562_v7, 4286644096  ;;  %v568_v20 = vld [vmem:[%s834_s0 + $0x50] sm:$0xff]   ;;  %v569_v21 = vld [vmem:[%s834_s0 + $0x58] sm:$0xff]   ;;  %v570_v22 = vld [vmem:[%s834_s0 + $0x60] sm:$0xff]  }
   0x6   :  { %v270_v23 = vmax.bf16 %v268_v19, %v262_v14  ;;  %v272_v24 = vsel %vm251_vm2, %v563_v9, 4286644096  ;;  %v571_v25 = vld [vmem:[%s834_s0 + $0x68] sm:$0xff]   ;;  %v572_v26 = vld [vmem:[%s834_s0 + $0x70] sm:$0xff]   ;;  %v573_v27 = vld [vmem:[%s834_s0 + $0x78] sm:$0xff]  }
   0x7   :  { %v274_v28 = vmax.bf16 %v272_v24, %v266_v18  ;;  %v276_v29 = vsel %vm251_vm2, %v564_v11, 4286644096  ;;  %v574_v30 = vld [vmem:[%s834_s0 + $0x80] sm:$0xff]   ;;  %v575_v31 = vld [vmem:[%s834_s0 + $0x88] sm:$0xff]   ;;  %v576_v32 = vld [vmem:[%s834_s0 + $0x90] sm:$0xff]  }
   0x8   :  { %v278_v33 = vmax.bf16 %v276_v29, %v270_v23  ;;  %v280_v34 = vsel %vm251_vm2, %v565_v13, 4286644096  ;;  %v577_v35 = vld [vmem:[%s834_s0 + $0x98] sm:$0xff]   ;;  %v578_v36 = vld [vmem:[%s834_s0 + $0xa0] sm:$0xff]   ;;  %v579_v37 = vld [vmem:[%s834_s0 + $0xa8] sm:$0xff]  }
   0x9   :  { %v282_v38 = vmax.bf16 %v280_v34, %v274_v28  ;;  %v284_v39 = vsel %vm251_vm2, %v566_v16, 4286644096  ;;  %v580_v40 = vld [vmem:[%s834_s0 + $0xb0] sm:$0xff]   ;;  %v581_v41 = vld [vmem:[%s834_s0 + $0xb8] sm:$0xff]   ;;  %v288_v43 = vsel %vm251_vm2, %v567_v17, 4286644096 }
   0xa   :  { %v286_v42 = vmax.bf16 %v284_v39, %v278_v33  ;;  %v292_v44 = vsel %vm251_vm2, %v568_v20, 4286644096  ;;  %v582_v45 = vld [vmem:[%s834_s0 + $0xc0] sm:$0xff]   ;;  %v583_v46 = vld [vmem:[%s834_s0 + $0xc8] sm:$0xff]   ;;  %v296_v48 = vsel %vm251_vm2, %v569_v21, 4286644096 }
   0xb   :  { %v290_v47 = vmax.bf16 %v288_v43, %v282_v38  ;;  %v300_v49 = vsel %vm251_vm2, %v570_v22, 4286644096  ;;  %v304_v50 = vsel %vm251_vm2, %v571_v25, 4286644096  ;;  %v308_v52 = vsel %vm251_vm2, %v572_v26, 4286644096 }
   0xc   :  { %v294_v51 = vmax.bf16 %v292_v44, %v286_v42  ;;  %v312_v53 = vsel %vm251_vm2, %v573_v27, 4286644096  ;;  %v327_v54 = vsel %vm251_vm2, %v574_v30, 4286644096  ;;  %v330_v56 = vsel %vm251_vm2, %v575_v31, 4286644096 }
   0xd   :  { %v298_v55 = vmax.bf16 %v296_v48, %v290_v47  ;;  %v333_v57 = vsel %vm251_vm2, %v576_v32, 4286644096  ;;  %v337_v58 = vsel %vm251_vm2, %v577_v35, 4286644096  ;;  %v584_v59 = vld [vmem:[%s834_s0 + $0xd0] sm:$0xff]   ;;  %v585_v60 = vld [vmem:[%s834_s0 + $0xd8] sm:$0xff]  }
   0xe   :  { %v302_v61 = vmax.bf16 %v300_v49, %v294_v51  ;;  %v335_v62 = vmax.bf16 %v333_v57, %v327_v54  ;;  %v339_v63 = vmax.bf16 %v337_v58, %v330_v56  ;;  %v341_v0 = vsel %vm251_vm2, %v578_v36, 4286644096 }
   0xf   :  { %v306_v1 = vmax.bf16 %v304_v50, %v298_v55  ;;  %v345_v2 = vsel %vm251_vm2, %v579_v37, 4286644096  ;;  %v349_v3 = vsel %vm251_vm2, %v580_v40, 4286644096  ;;  %v353_v4 = vsel %vm251_vm2, %v581_v41, 4286644096 }
  0x10   :  { %v310_v5 = vmax.bf16 %v308_v52, %v302_v61  ;;  %v343_v6 = vmax.bf16 %v341_v0, %v335_v62  ;;  %v347_v7 = vmax.bf16 %v345_v2, %v339_v63 }
  0x11   :  { %12 = vsyncpa [#allocation6], 0  ;;  %v586_v8 = vld [vmem:[%s834_s0 + $0xe0] sm:$0xff]   ;;  %v587_v9 = vld [vmem:[%s834_s0 + $0xe8] sm:$0xff]   ;;  %v314_v10 = vmax.bf16 %v312_v53, %v306_v1  ;;  %v357_v11 = vsel %vm251_vm2, %v582_v45, 4286644096 }
  0x12   :  { %v361_v12 = vsel %vm251_vm2, %v583_v46, 4286644096  ;;  %v351_v13 = vmax.bf16 %v349_v3, %v343_v6  ;;  %v355_v14 = vmax.bf16 %v353_v4, %v347_v7  ;;  %v588_v15 = vld [vmem:[%s834_s0 + $0xf0] sm:$0xff]   ;;  %v589_v16 = vld [vmem:[%s834_s0 + $0xf8] sm:$0xff]   ;;  %v365_v18 = vsel %vm251_vm2, %v584_v59, 4286644096 }
  0x13   :  { %v315_v17 = vmax.bf16 %v314_v10, %v310_v5  ;;  %v369_v19 = vsel %vm251_vm2, %v585_v60, 4286644096  ;;  %v373_v24 = vsel %vm251_vm2, %v586_v8, 4286644096  ;;  %v377_v25 = vsel %vm251_vm2, %v587_v9, 4286644096 }
  0x14   :  { %v359_v20 = vmax.bf16 %v357_v11, %v351_v13  ;;  %v363_v21 = vmax.bf16 %v361_v12, %v355_v14  ;;  %v381_v29 = vsel %vm251_vm2, %v588_v15, 4286644096  ;;  %v385_v30 = vsel %vm251_vm2, %v589_v16, 4286644096  ;;  %v543_v56 = vld [vmem:[%s835_s1] ss:$0 sm:$0xff] }
  0x15   :  { %v316_v22 = vunpack.i.l.bf16 %v315_v17  ;;  %v317_v23 = vunpack.i.h.bf16 %v315_v17  ;;  %v544_v59 = vld [vmem:[%s836_s2] ss:$0 sm:$0xff]  ;;  %vm424_vm3 = vcmask 1041409   ;;  %vm427_vm4 = vcmask 25600   ;;  %s640_s1 = smov [#allocation5]  }
  0x16   :  { %v367_v26 = vmax.bf16 %v365_v18, %v359_v20  ;;  %v371_v27 = vmax.bf16 %v369_v19, %v363_v21  ;;  %s499_s9 = sshll.u32 %s640_s1, 4  ;;  %s500_s9 = int_to_ptr.vmem [resolvable:$true] %s499_s9 }
  0x17   :  { %v318_v28 = vmax.f32 %v316_v22, %v317_v23  ;;  %s590_s10 = scalar_lea.vmem %s500_s9, 32  ;;  %p595_p1 = scmp.lt.s32.totalorder %s500_s9, %s500_s9 }
  0x18   :  { %v375_v31 = vmax.bf16 %v373_v24, %v367_v26  ;;  %v379_v32 = vmax.bf16 %v377_v25, %v371_v27  ;;  %p591_p0 = scmp.ne.s32.totalorder %s500_s9, %s590_s10  ;;  %p596_p2 = scmp.lt.s32.totalorder %s590_s10, %s590_s10 }
  0x19   :  { %v319_v33 = vrot.slane %v318_v28, 4 }
  0x1a   :  { %v383_v34 = vmax.bf16 %v381_v29, %v375_v31  ;;  %v387_v35 = vmax.bf16 %v385_v30, %v379_v32  ;;  %p597_p3 = por %p596_p2, %p595_p1 }
  0x1b   :  { %v320_v36 = vmax.f32 %v318_v28, %v319_v33 }
  0x1c   :  { %v388_v37 = vmax.bf16 %v387_v35, %v383_v34  ;;  %p598_p4 = pnand %p597_p3, %p591_p0 }
  0x1d   :  { %v321_v38 = vrot.slane %v320_v36, 2 }
  0x1e   :  { %v389_v39 = vunpack.i.l.bf16 %v388_v37  ;;  %v390_v40 = vunpack.i.h.bf16 %v388_v37 }
  0x1f   :  { %v322_v41 = vmax.f32 %v320_v36, %v321_v38 }
  0x20   :  { %v391_v42 = vmax.f32 %v389_v39, %v390_v40 }
  0x21   :  { %v323_v43 = vrot.slane %v322_v41, 1 }
  0x22   :  { %v392_v44 = vrot.slane %v391_v42, 4 }
  0x23   :  { %v324_v45 = vmax.f32 %v322_v41, %v323_v43 }
  0x24   :  { %v393_v46 = vmax.f32 %v391_v42, %v392_v44 }
  0x25   :  { %v325_v47 = vpack.i.bf16 %v324_v45, %v324_v45 }
  0x26   :  { %v394_v48 = vrot.slane %v393_v46, 2 }
  0x27   :  { %v399_v51 = vunpack.c.l.bf16 %v325_v47 }
  0x28   :  { %v395_v49 = vmax.f32 %v393_v46, %v394_v48 }
  0x29   :  { %v401_v54 = vmax.f32 %v399_v51, 0.0 }
  0x2a   :  { %v396_v50 = vrot.slane %v395_v49, 1 }
  0x2b   :  { %v410_v58 = vmul.f32 %v543_v56, %v401_v54 }
  0x2c   :  { %v397_v52 = vmax.f32 %v395_v49, %v396_v50 }
  0x2d   :  { %v419_v61 = vadd.f32 %v544_v59, %v410_v58 }
  0x2e   :  { %v398_v53 = vpack.i.bf16 %v397_v52, %v397_v52 }
  0x30   :  { %v400_v55 = vunpack.c.l.bf16 %v398_v53 }
  0x32   :  { %v402_v57 = vmax.f32 %v400_v55, 0.0 }
  0x34   :  { %v411_v60 = vmul.f32 %v543_v56, %v402_v57 }
  0x36   :  { %v420_v62 = vadd.f32 %v544_v59, %v411_v60 }
  0x38   :  { %v423_v63 = vrot.slane %v420_v62, 7 }
  0x3a   :  { %v425_v0 = vsel %vm424_vm3, %v423_v63, %v419_v61 }
  0x3b   :  { %428 = vst.msk [vmem:[#allocation2] sm:$0x3] %vm427_vm4, %v425_v0  ;;  %429 = vst.msk [vmem:[#allocation5] sm:$0x3] %vm427_vm4, %v425_v0 }
  0x42   :  { %v430_v1 = vld [vmem:[#allocation2] sm:$0x3] }
  0x43   :  { %v431_v2 = vpack.c.bf16 %v430_v1, %v430_v1 }
  0x45   :  { %551 = vmatmul.mubr.msk.bf16.vlgmr.msra.gmra.mrb[0].mxu0 %vm251_vm2, %v431_v2 }
  0x46   :  { %601 = shalt.err (!%p598_p4)
}
  0x47   :  { %s602_s12 = scalar_lea.hbm %s839_s5, 32 }
  0x48   :  { %p603_p5 = scmp.ne.s32.totalorder %s839_s5, %s602_s12  ;;  %p606_p6 = scmp.lt.u32.totalorder %s602_s12, %s839_s5 }
  0x4a   :  { %p608_p7 = pnand %p606_p6, %p603_p5 }
  0x4c   :  { %611 = shalt.err (!%p608_p7)
}
  0x4d   :  { %502 = dma.vmem_to_hbm [thread:$0]  %s500_s9, 32, %s839_s5, [#allocation6]   ;;  %vm481_vm5 = vcmask 58368  }
  0x4e   :  { %s641_s19 = smov [#allocation3]  }
  0x4f   :  { %s489_s20 = sshll.u32 %s641_s19, 4  ;;  %s490_s20 = int_to_ptr.vmem [resolvable:$true] %s489_s20 }
  0x50   :  { %s612_s21 = scalar_lea.vmem %s490_s20, 32  ;;  %p617_p9 = scmp.lt.s32.totalorder %s490_s20, %s490_s20 }
  0x51   :  { %p613_p8 = scmp.ne.s32.totalorder %s490_s20, %s612_s21  ;;  %p618_p10 = scmp.lt.s32.totalorder %s612_s21, %s612_s21 }
  0x53   :  { %p619_p11 = por %p618_p10, %p617_p9 }
  0x55   :  { %p620_p12 = pnand %p619_p11, %p613_p8 }
 0x118   :  { %v475_v3 = vpop.f32.mrb[0].mxu0 }
 0x119   :  { %v552_v4 = vpop.f32.mrb[1].mxu0  ;;  %482 = vst.msk [vmem:[#allocation3] sm:$0x3] %vm481_vm5, %v475_v3 }
 0x11a   :  { %v478_v5 = vpop.f32.mrb[2].mxu0 }
 0x11b   :  { %623 = shalt.err (!%p620_p12)
}
 0x11c   :  { %s624_s24 = scalar_lea.hbm %s838_s4, 32 }
 0x11d   :  { %p625_p13 = scmp.ne.s32.totalorder %s838_s4, %s624_s24  ;;  %p628_p0 = scmp.lt.u32.totalorder %s624_s24, %s838_s4 }
 0x11f   :  { %p630_p1 = pnand %p628_p0, %p625_p13 }
 0x121   :  { %633 = shalt.err (!%p630_p1)
}
 0x122   :  { %492 = dma.vmem_to_hbm [thread:$0]  %s490_s20, 32, %s838_s4, [#allocation4]   ;;  %v553_v6 = vpop.f32.mrb[3].mxu0 }
 0x123   :  { %634 = dma.done.wait [#allocation4], 32  }
 0x124   :  { %635 = vsyncadd [#allocation4], 4294967264 }
 0x125   :  { %636 = dma.done.wait [#allocation6], 32  }
 0x126   :  { %637 = vsyncadd [#allocation6], 4294967264 }
 0x127   :  { %509 = vsyncpa [#allocation4], 1 }
 0x128   :  { %510 = vsyncpa [#allocation6], 1 }

</bundles_post_ra>
